<compile_context>
chip_gen: v5e
topology: v5e:2x2
jax: 0.10.0
libtpu: 0.0.40
codegen_flags: <defaults>
</compile_context>

<pallas_src>
import jax
import jax.numpy as jnp
from jax.experimental import pallas as pl
from jax.experimental.pallas import tpu as pltpu


def _round_up(x, m):
    return (x + m - 1) // m * m


def classifier_kernel(x_ref, w_ref, b_ref, o_ref, acc_ref):
    k = pl.program_id(1)

    @pl.when(k == 0)
    def _():
        acc_ref[...] = jnp.zeros_like(acc_ref)

    # MXU matmul: cast the f32 x tile to bf16 in-kernel (VPU filler hidden under the DMA
    # pipeline); W is already bf16 in (F, O) stored layout.  f32 accumulation.
    acc_ref[...] += jnp.dot(
        x_ref[...].astype(jnp.bfloat16),
        w_ref[...],
        preferred_element_type=jnp.float32,
    )

    @pl.when(k == pl.num_programs(1) - 1)
    def _():
        # Padded class columns carry a -1e30 bias (and zero W columns), so they vanish in the
        # softmax without any in-kernel mask.
        logits = acc_ref[...] + b_ref[...]
        m = jnp.max(logits, axis=1, keepdims=True)
        e = jnp.exp(logits - m)            # f32 exp; bf16-exp only if profiling shows EUP-bound
        denom = jnp.sum(e, axis=1, keepdims=True)
        # Exact reciprocal so rows sum to 1 within f32 rounding (approx=True is only ~1e-3).
        o_ref[...] = (e * pl.reciprocal(denom, approx=False)).astype(o_ref.dtype)


def prepare_classifier_params(w, b, *, max_k_tile=512):
    """One-time weight prep, hoisted out of the per-forward path.

    w: (O, F) f32 (PyTorch nn.Linear layout); b: (O,) or (1, O).
    Returns (w_p, b_p, outdim):
      w_p: (F_pad, O_pad) bf16, transposed so the MXU consumes its stored layout;
           zero padding contributes nothing to the dot.
      b_p: (1, O_pad) f32 with -1e30 in the padded class columns (implicit softmax mask).
    """
    O, F = w.shape
    b = jnp.asarray(b).reshape(1, O).astype(jnp.float32)

    F_pad = _round_up(F, 128)
    TK = min(F_pad, max_k_tile)
    F_pad = _round_up(F_pad, TK)          # keep the K axis an exact multiple of the K tile
    O_pad = _round_up(O, 128)

    w_p = jnp.zeros((F_pad, O_pad), jnp.bfloat16).at[:F, :O].set(w.T.astype(jnp.bfloat16))
    b_p = jnp.full((1, O_pad), -1e30, jnp.float32).at[:, :O].set(b)
    return w_p, b_p, O


def classifier_forward(x, w_p, b_p, outdim, *, block_m=512, max_k_tile=512,
                       out_dtype=jnp.float32):
    """x: (B, F) f32; w_p/b_p from prepare_classifier_params -> (B, outdim) out_dtype."""
    B, F = x.shape
    F_pad, O_pad = w_p.shape

    # Batch tile: 16-row granularity (native bf16 sublane tile), up to block_m rows per step.
    TM = min(_round_up(B, 16), _round_up(block_m, 16))
    B_pad = _round_up(B, TM)
    TK = min(F_pad, max_k_tile)
    assert F_pad % TK == 0

    # Only zero-pad x when it is not already tile aligned; no bf16 copy is made here
    # (the cast happens in-kernel).  Zero rows/cols are inert for the matmul.
    if (B_pad, F_pad) != (B, F):
        x_in = jnp.zeros((B_pad, F_pad), x.dtype).at[:B, :F].set(x)
    else:
        x_in = x

    grid = (B_pad // TM, F_pad // TK)

    # Explicit scoped-VMEM budget: double-buffered x/W/bias/out tiles + accumulator + headroom.
    vmem_bytes = (
        2 * TM * TK * 4          # x tiles (f32)
        + 2 * TK * O_pad * 2     # W tiles (bf16)
        + 2 * 8 * O_pad * 4      # bias (f32, one sublane tile)
        + 2 * TM * O_pad * 4     # out tiles
        + TM * O_pad * 4         # f32 accumulator scratch
    )
    vmem_limit = int(min(vmem_bytes + (4 << 20), 64 << 20))

    out = pl.pallas_call(
        classifier_kernel,
        out_shape=jax.ShapeDtypeStruct((B_pad, O_pad), out_dtype),
        grid=grid,
        in_specs=[
            pl.BlockSpec((TM, TK), lambda i, k: (i, k)),      # x tile moves with (batch, K)
            pl.BlockSpec((TK, O_pad), lambda i, k: (k, 0)),   # W streamed along K
            pl.BlockSpec((1, O_pad), lambda i, k: (0, 0)),    # bias resident
            # NOTE: on JAX versions exposing BlockSpec(pipeline_mode=...), the constant-index
            # W/bias blocks could be single-buffered via pl.Buffered(1) to save VMEM.
        ],
        out_specs=pl.BlockSpec((TM, O_pad), lambda i, k: (i, 0)),
        scratch_shapes=[pltpu.VMEM((TM, O_pad), jnp.float32)],
        compiler_params=pltpu.CompilerParams(
            dimension_semantics=("parallel", "arbitrary"),
            vmem_limit_bytes=vmem_limit,
        ),
    )(x_in, w_p, b_p)

    # Strip batch/class padding.  (Callers that can consume the padded layout may skip this.)
    return out[:B, :outdim]
    # For very large outdim (big-vocab heads, O_pad*TK beyond VMEM) an O-tiled grid axis with
    # an online (running max/sum) softmax would be needed; not required at these sizes.


if __name__ == "__main__":
    key = jax.random.PRNGKey(0)
    k_x, k_w, k_b = jax.random.split(key, 3)

    batch = 8
    input_features = 64
    outdim = 10

    # Deterministic parameter init (mimics PyTorch Linear uniform(-1/sqrt(fan_in), 1/sqrt(fan_in)))
    bound = 1.0 / (input_features ** 0.5)
    w = jax.random.uniform(k_w, (outdim, input_features), jnp.float32, -bound, bound)
    b = jax.random.uniform(k_b, (1, outdim), jnp.float32, -bound, bound)

    x = jax.random.normal(k_x, (batch, input_features), jnp.float32)

    # Weight prep is done once (hoisted out of the per-call path).
    w_p, b_p, O = prepare_classifier_params(w, b)

    out = classifier_forward(x, w_p, b_p, O)
    out = jax.block_until_ready(out)

    # Sanity checks.
    assert out.shape == (batch, outdim)
    row_sums = jnp.sum(out, axis=1)
    assert bool(jnp.all(jnp.abs(row_sums - 1.0) < 1e-3))

    # Reference (f32) softmax(x @ W^T + b); loose tolerance for bf16 matmul operands.
    ref = jax.nn.softmax(x @ w.T + b, axis=1)
    assert bool(jnp.all(jnp.abs(out - ref) < 2e-2))

    print("KERNEL_OK")
</pallas_src>

<mosaic_0001>
module attributes {stable_mosaic.version = 11 : i64} {
  func.func @classifier_kernel(%arg0: i32, %arg1: i32, %arg2: memref<16x128xf32, #tpu.memory_space<vmem>>, %arg3: memref<128x128xbf16, #tpu.memory_space<vmem>>, %arg4: memref<1x128xf32, #tpu.memory_space<vmem>>, %arg5: memref<16x128xf32, #tpu.memory_space<vmem>>, %arg6: memref<16x128xf32, #tpu.memory_space<vmem>>) attributes {dimension_semantics = [#tpu.dimension_semantics<parallel>, #tpu.dimension_semantics<arbitrary>], iteration_bounds = array<i64: 1, 1>, scalar_prefetch = 0 : i64, scratch_operands = 1 : i64, tpu.core_type = #tpu.core_type<tc>, window_params = [{transform_indices = @transform_0, window_bounds = array<i64: 16, 128>}, {transform_indices = @transform_1, window_bounds = array<i64: 128, 128>}, {pipeline_mode = #tpu.pipeline_mode<synchronous>, transform_indices = @transform_2, window_bounds = array<i64: 1, 128>}, {transform_indices = @transform_3, window_bounds = array<i64: 16, 128>}]} {
    %c0_i32 = arith.constant 0 : i32
    %0 = arith.cmpi eq, %arg1, %c0_i32 : i32
    %1 = arith.extui %0 : i1 to i32
    %c0_i32_0 = arith.constant 0 : i32
    %2 = arith.cmpi ne, %1, %c0_i32_0 : i32
    scf.if %2 {
      %cst_10 = arith.constant 0.000000e+00 : f32
      %13 = vector.broadcast %cst_10 : f32 to vector<16x128xf32>
      %c0_11 = arith.constant 0 : index
      %c0_12 = arith.constant 0 : index
      %14 = vector.load %arg6[%c0_11, %c0_12] : memref<16x128xf32, #tpu.memory_space<vmem>>, vector<16x128xf32>
      tpu.vector_store %arg6[%c0_11, %c0_12], %13 {strides = array<i32>} : memref<16x128xf32, #tpu.memory_space<vmem>>, vector<16x128xf32>,
    } else {
    }
    %c0 = arith.constant 0 : index
    %c0_1 = arith.constant 0 : index
    %3 = vector.load %arg6[%c0, %c0_1] : memref<16x128xf32, #tpu.memory_space<vmem>>, vector<16x128xf32>
    %c0_2 = arith.constant 0 : index
    %c0_3 = arith.constant 0 : index
    %4 = vector.load %arg2[%c0_2, %c0_3] : memref<16x128xf32, #tpu.memory_space<vmem>>, vector<16x128xf32>
    %5 = arith.truncf %4 : vector<16x128xf32> to vector<16x128xbf16>
    %c0_4 = arith.constant 0 : index
    %c0_5 = arith.constant 0 : index
    %6 = vector.load %arg3[%c0_4, %c0_5] : memref<128x128xbf16, #tpu.memory_space<vmem>>, vector<128x128xbf16>
    %cst = arith.constant dense<0.000000e+00> : vector<16x128xf32>
    %7 = tpu.matmul %5, %6, %cst {dimension_numbers = #tpu.dot_dimension_numbers<[1], [0], [0], [1], [0, 0, 1, 1], [], []>} : vector<16x128xbf16>, vector<128x128xbf16>, vector<16x128xf32> -> vector<16x128xf32>
    %8 = arith.addf %3, %7 : vector<16x128xf32>
    %c0_6 = arith.constant 0 : index
    %c0_7 = arith.constant 0 : index
    %9 = vector.load %arg6[%c0_6, %c0_7] : memref<16x128xf32, #tpu.memory_space<vmem>>, vector<16x128xf32>
    tpu.vector_store %arg6[%c0_6, %c0_7], %8 {strides = array<i32>} : memref<16x128xf32, #tpu.memory_space<vmem>>, vector<16x128xf32>,
    %c0_i32_8 = arith.constant 0 : i32
    %10 = arith.cmpi eq, %arg1, %c0_i32_8 : i32
    %11 = arith.extui %10 : i1 to i32
    %c0_i32_9 = arith.constant 0 : i32
    %12 = arith.cmpi ne, %11, %c0_i32_9 : i32
    scf.if %12 {
      %c0_10 = arith.constant 0 : index
      %c0_11 = arith.constant 0 : index
      %13 = vector.load %arg6[%c0_10, %c0_11] : memref<16x128xf32, #tpu.memory_space<vmem>>, vector<16x128xf32>
      %c0_12 = arith.constant 0 : index
      %c0_13 = arith.constant 0 : index
      %14 = vector.load %arg4[%c0_12, %c0_13] : memref<1x128xf32, #tpu.memory_space<vmem>>, vector<1x128xf32>
      %15 = vector.broadcast %14 : vector<1x128xf32> to vector<16x128xf32>
      %16 = arith.addf %13, %15 : vector<16x128xf32>
      %cst_14 = arith.constant dense<0xFF800000> : vector<16xf32>
      %17 = vector.multi_reduction <maximumf>, %16, %cst_14 [1] : vector<16x128xf32> to vector<16xf32>
      %18 = vector.shape_cast %17 : vector<16xf32> to vector<16x1xf32>
      %19 = vector.broadcast %18 : vector<16x1xf32> to vector<16x128xf32>
      %20 = arith.subf %16, %19 : vector<16x128xf32>
      %21 = math.exp %20 : vector<16x128xf32>
      %cst_15 = arith.constant dense<0.000000e+00> : vector<16xf32>
      %22 = vector.multi_reduction <add>, %21, %cst_15 [1] : vector<16x128xf32> to vector<16xf32>
      %23 = vector.shape_cast %22 : vector<16xf32> to vector<16x1xf32>
      %24 = tpu.reciprocal %23 : vector<16x1xf32> -> vector<16x1xf32>
      %25 = vector.broadcast %24 : vector<16x1xf32> to vector<16x128xf32>
      %26 = arith.mulf %21, %25 : vector<16x128xf32>
      %c0_16 = arith.constant 0 : index
      %c0_17 = arith.constant 0 : index
      %27 = vector.load %arg5[%c0_16, %c0_17] : memref<16x128xf32, #tpu.memory_space<vmem>>, vector<16x128xf32>
      tpu.vector_store %arg5[%c0_16, %c0_17], %26 {strides = array<i32>} : memref<16x128xf32, #tpu.memory_space<vmem>>, vector<16x128xf32>,
    } else {
    }
    return
  }
  func.func @transform_0(%arg0: i32, %arg1: i32) -> (i32, i32) {
    %c0_i32 = arith.constant 0 : i32
    return %arg0, %arg1 : i32, i32
  }
  func.func @transform_1(%arg0: i32, %arg1: i32) -> (i32, i32) {
    %c0_i32 = arith.constant 0 : i32
    %c0_i32_0 = arith.constant 0 : i32
    return %arg1, %c0_i32 : i32, i32
  }
  func.func @transform_2(%arg0: i32, %arg1: i32) -> (i32, i32) {
    %c0_i32 = arith.constant 0 : i32
    %c0_i32_0 = arith.constant 0 : i32
    %c0_i32_1 = arith.constant 0 : i32
    return %c0_i32, %c0_i32_0 : i32, i32
  }
  func.func @transform_3(%arg0: i32, %arg1: i32) -> (i32, i32) {
    %c0_i32 = arith.constant 0 : i32
    %c0_i32_0 = arith.constant 0 : i32
    return %arg0, %c0_i32 : i32, i32
  }
}

</mosaic_0001>

<bundles_post_ra>
// kernel: tpu_custom_call.1
= control target key start
LH: loop header
LB: loop body
LE: loop exit
PB: predicated region body
PF: predicated region fallthrough
CT: control target
= control target key end

     0   :  { %8 = vsyncpa [#allocation4], 0  ;;  %s396_s0 = inlined_call_operand.hbm [shape: f32[16,128], index: 0, kind: input, shape index: {}]   ;;  %s397_s1 = inlined_call_operand.hbm [shape: bf16[128,128], index: 1, kind: input, shape index: {}]   ;;  %s398_s2 = inlined_call_operand.vmem [shape: f32[1,128], index: 2, kind: input, shape index: {}]   ;;  %s399_s3 = inlined_call_operand.hbm [shape: f32[16,128], index: 3, kind: output, shape index: {}]  }
   0x1   :  { %9 = vsyncpa [#allocation7], 0 }
   0x2   :  { %10 = vsyncpa [#allocation5], 0  ;;  %s15_s14 = sshll.u32 %s396_s0, 4  ;;  %s351_s15 = smov [#allocation3]   ;;  %s16_s14 = int_to_ptr.hbm [resolvable:$true] %s15_s14 }
   0x3   :  { %s17_s16 = sshll.u32 %s351_s15, 4  ;;  %s28_s19 = sshll.u32 %s397_s1, 4  ;;  %s18_s16 = int_to_ptr.vmem [resolvable:$true] %s17_s16  ;;  %s29_s19 = int_to_ptr.hbm [resolvable:$true] %s28_s19 }
   0x4   :  { %s352_s20 = smov 128   ;;  %s353_s21 = smov 8  }
   0x5   :  { %23 = dma.hbm_to_vmem [thread:$0]  %s16_s14, 256, %s18_s16, [#allocation4], %s352_s20, %s352_s20, %s353_s21  }
   0x6   :  { %s354_s22 = smov [#allocation6]   ;;  %s355_s24 = smov 64  }
   0x7   :  { %s30_s23 = sshll.u32 %s354_s22, 4  ;;  %s356_s0 = smov 4   ;;  %s31_s23 = int_to_ptr.vmem [resolvable:$true] %s30_s23 }
   0x8   :  { %36 = dma.hbm_to_vmem [thread:$0]  %s29_s19, 1024, %s31_s23, [#allocation7], %s355_s24, %s355_s24, %s356_s0  }
   0x9   :  { %345 = dma.done.wait [#allocation4], 256  }
   0xa   :  { %346 = vsyncadd [#allocation4], 4294967040 }
   0xb   :  { %347 = dma.done.wait [#allocation7], 1024  }
   0xc   :  { %348 = vsyncadd [#allocation7], 4294966272  ;;  %v256_v0 = vld [vmem:[#allocation6 + $0x38] sm:$0xff]  ;;  %v255_v1 = vld [vmem:[#allocation6 + $0x30] sm:$0xff]  ;;  %s203_s29 = sshll.u32 %s399_s3, 4  ;;  %s204_s29 = int_to_ptr.hbm [resolvable:$true] %s203_s29 }
   0xd   :  { %122 = vmatpush.bf16.msra.mxu0 %v256_v0  ;;  %v254_v2 = vld [vmem:[#allocation6 + $0x28] sm:$0xff]  ;;  %v253_v3 = vld [vmem:[#allocation6 + $0x20] sm:$0xff]  ;;  %v252_v4 = vld [vmem:[#allocation6 + $0x18] sm:$0xff] }
   0xe   :  { %v251_v5 = vld [vmem:[#allocation6 + $0x10] sm:$0xff]  ;;  %v250_v6 = vld [vmem:[#allocation6 + $0x8] sm:$0xff]  ;;  %v249_v7 = vld [vmem:[#allocation6] sm:$0xff] }
   0xf   :  { %v55_v8 = vld [vmem:[#allocation3] sm:$0xff]  ;;  %v56_v9 = vld [vmem:[#allocation3 + $0x8] sm:$0xff] }
  0x10   :  { %v57_v10 = vpack.c.bf16 %v56_v9, %v55_v8  ;;  %v264_v11 = vld [vmem:[%s398_s2] ss:$0 sm:$0xff]  ;;  %s357_s2 = smov [#allocation8]  }
  0x11   :  { %123 = vmatpush.bf16.msra.mxu0 %v255_v1  ;;  %s201_s26 = sshll.u32 %s357_s2, 4  ;;  %s202_s26 = int_to_ptr.vmem [resolvable:$true] %s201_s26 }
  0x15   :  { %124 = vmatpush.bf16.msra.mxu0 %v254_v2 }
  0x19   :  { %125 = vmatpush.bf16.msra.mxu0 %v253_v3 }
  0x1d   :  { %126 = vmatpush.bf16.msra.mxu0 %v252_v4 }
  0x21   :  { %127 = vmatpush.bf16.msra.mxu0 %v251_v5 }
  0x25   :  { %128 = vmatpush.bf16.msra.mxu0 %v250_v6 }
  0x29   :  { %129 = vmatpush.bf16.msra.mxu0 %v249_v7 }
  0x2c   :  { %130 = vmatmul.bf16.vlgmr.msra.gmra.mxu0 %v57_v10 }
  0xa9   :  { %v131_v12 = vpop.f32.mrf.mxu0 }
  0xaa   :  { %v149_v13 = vadd.f32 %v264_v11, %v131_v12 }
  0xac   :  { %151 = vmax.xlane.f32.xlu0 %v149_v13 }
  0xb1   :  { %v133_v14 = vpop.f32.mrf.mxu0 }
  0xb2   :  { %v150_v15 = vadd.f32 %v264_v11, %v133_v14 }
  0xb4   :  { %153 = vmax.xlane.f32.xlu0 %v150_v15 }
 0x11f   :  { %v152_v16 = vpop.xlane.xlu0 %151 }
 0x120   :  { %v155_v17 = vsub.f32 %v149_v13, %v152_v16 }
 0x122   :  { %v157_v18 = vmul.f32 1.442695, %v155_v17 }
 0x124   :  { %265 = vpow2.f32 %v157_v18 }
 0x127   :  { %v154_v19 = vpop.xlane.xlu0 %153 }
 0x128   :  { %v156_v20 = vsub.f32 %v150_v15, %v154_v19 }
 0x12a   :  { %v266_v21 = vpop.eup %265  ;;  %v159_v22 = vmul.f32 1.442695, %v156_v20 }
 0x12b   :  { %161 = vadd.xlane.f32.xlu1 %v266_v21 }
 0x12c   :  { %267 = vpow2.f32 %v159_v22 }
 0x132   :  { %v268_v23 = vpop.eup %267 }
 0x133   :  { %163 = vadd.xlane.f32.xlu1 %v268_v23 }
 0x19e   :  { %v162_v24 = vpop.xlane.xlu1 %161 }
 0x19f   :  { %269 = vrcp.f32 %v162_v24  ;;  %v176_v29 = vand.u32 2147483648, %v162_v24  ;;  %v174_v31 = vand.u32 2147483647, %v162_v24  ;;  %vm170_vm1 = vweird.f32 %v162_v24 }
 0x1a1   :  { %v177_v34 = vor.u32 1.1754944e-38, %v176_v29  ;;  %vm175_vm3 = vcmp.eq.f32.partialorder %v174_v31, 8.507059e+37 }
 0x1a5   :  { %v270_v25 = vpop.eup %269 }
 0x1a6   :  { %v166_v26 = vmul.f32 %v270_v25, %v162_v24  ;;  %v164_v27 = vpop.xlane.xlu1 %163  ;;  %vm171_vm0 = vweird.f32 %v270_v25 }
 0x1a7   :  { %271 = vrcp.f32 %v164_v27  ;;  %vm172_vm2 = vmor %vm170_vm1, %vm171_vm0  ;;  %v190_v40 = vand.u32 2147483648, %v164_v27  ;;  %v188_v42 = vand.u32 2147483647, %v164_v27  ;;  %vm184_vm5 = vweird.f32 %v164_v27 }
 0x1a8   :  { %v167_v28 = vsub.f32 1.0, %v166_v26 }
 0x1a9   :  { %v191_v44 = vor.u32 1.1754944e-38, %v190_v40  ;;  %vm189_vm7 = vcmp.eq.f32.partialorder %v188_v42, 8.507059e+37 }
 0x1aa   :  { %v168_v30 = vmul.f32 %v270_v25, %v167_v28 }
 0x1ac   :  { %v169_v32 = vadd.f32 %v270_v25, %v168_v30 }
 0x1ad   :  { %v272_v33 = vpop.eup %271 }
 0x1ae   :  { %v180_v35 = vmul.f32 %v272_v33, %v164_v27  ;;  %v173_v36 = vsel %vm172_vm2, %v270_v25, %v169_v32  ;;  %vm185_vm4 = vweird.f32 %v272_v33 }
 0x1af   :  { %v178_v37 = vsel %vm175_vm3, %v177_v34, %v173_v36  ;;  %vm186_vm6 = vmor %vm184_vm5, %vm185_vm4 }
 0x1b0   :  { %v181_v38 = vsub.f32 1.0, %v180_v35  ;;  %v193_v39 = vmul.f32 %v266_v21, %v178_v37 }
 0x1b2   :  { %v182_v41 = vmul.f32 %v272_v33, %v181_v38  ;;  %195 = vst [vmem:[#allocation8] sm:$0xff] %v193_v39 }
 0x1b4   :  { %v183_v43 = vadd.f32 %v272_v33, %v182_v41 }
 0x1b6   :  { %v187_v45 = vsel %vm186_vm6, %v272_v33, %v183_v43 }
 0x1b7   :  { %v192_v46 = vsel %vm189_vm7, %v191_v44, %v187_v45 }
 0x1b8   :  { %v194_v47 = vmul.f32 %v268_v23, %v192_v46 }
 0x1ba   :  { %196 = vst [vmem:[#allocation8 + $0x8] sm:$0xff] %v194_v47 }
 0x1bb   :  { %209 = dma.vmem_to_hbm [thread:$0]  %s202_s26, 256, %s204_s29, [#allocation5], %s352_s20, %s352_s20, %s353_s21  }
 0x1bc   :  { %349 = dma.done.wait [#allocation5], 256  }
 0x1bd   :  { %350 = vsyncadd [#allocation5], 4294967040 }
 0x1be   :  { %214 = vsyncpa [#allocation4], 1 }
 0x1bf   :  { %215 = vsyncpa [#allocation7], 1 }
 0x1c0   :  { %216 = vsyncpa [#allocation5], 1 }

</bundles_post_ra>
